<compile_context>
chip_gen: v7x
topology: tpu7x:2x2x1
jax: 0.10.0
libtpu: 0.0.40
codegen_flags: <defaults>
</compile_context>

<pallas_src>
import jax
import jax.numpy as jnp
from jax import lax
from jax.experimental import pallas as pl
from jax.experimental.pallas import tpu as pltpu

_REC_PAD = 8  # sublane-aligned start of W_hh^T inside the packed recurrent buffer


def rnn_kernel(x_ref, wrec_ref, wout_ref, y_ref):
    # x_ref    : (B, T, D)   raw batch-first input, exactly as given to forward()
    # wrec_ref : (8 + H, H)  rows 0..D-1 = W_ih^T, row D = b_ih + b_hh,
    #                        rows 8..8+H-1 = W_hh^T (rows D+1..7 are zero pad)
    # wout_ref : (H + 8, O)  rows 0..H-1 = W_out^T, row H = b_out (rest zero)
    # y_ref    : (B, O)
    B, T, D = x_ref.shape
    H = wrec_ref.shape[1]

    wrec = wrec_ref[...]                                    # (8+H, H) f32
    wih = wrec[0:D, :].astype(jnp.bfloat16)                 # (D, H)  bf16
    b = wrec[D:D + 1, :]                                    # (1, H)  f32
    whh = wrec[_REC_PAD:_REC_PAD + H, :].astype(jnp.bfloat16)  # (H, H) bf16

    # Hoisted, non-recurrent input projection for ALL timesteps in ONE matmul.
    # (B, T, D) -> (B*T, D) is a layout-preserving reshape (leading dims are
    # stacked sublane tiles); row b*T + t corresponds to (batch b, time t).
    x2d = x_ref[...].reshape(B * T, D).astype(jnp.bfloat16)
    xw = jnp.dot(x2d, wih, preferred_element_type=jnp.float32) + b   # (B*T, H) f32
    xw3 = xw.reshape(B, T, H)

    # Recurrence, fully unrolled (T small & static). h0 == 0, so step 0 needs
    # no hidden matmul. The per-step xw3[:, t, :] selects depend only on xw,
    # so the LLO scheduler overlaps them with the serial h @ W_hh MXU chain.
    h = jnp.tanh(xw3[:, 0, :])                                        # (B, H) f32
    for t in range(1, T):
        pre = xw3[:, t, :] + jnp.dot(h.astype(jnp.bfloat16), whh,
                                     preferred_element_type=jnp.float32)
        h = jnp.tanh(pre)
    # TODO(synk): holding W_hh resident in the MXU weight registers via
    # pltpu.matmul_push_rhs / matmul_acc_lhs / matmul_pop would shave the
    # per-step RHS flow-through latency; kept on jnp.dot for robustness.
    # TODO(synk): training-mode Dropout(p=0.5) would need pltpu PRNG; this is
    # eval-mode dropout (identity), matching model.eval().

    wo = wout_ref[...]                                      # (H+8, O) f32
    wout = wo[0:H, :].astype(jnp.bfloat16)                  # (H, O) bf16
    bout = wo[H:H + 1, :]                                   # (1, O) f32
    y = jnp.dot(h.astype(jnp.bfloat16), wout,
                preferred_element_type=jnp.float32) + bout
    y_ref[...] = y.astype(y_ref.dtype)


def pack_params(w_ih, w_hh, b_ih, b_hh, w_out, b_out):
    """One-time parameter prep (do at load time, NOT per forward call).

    PyTorch layouts in: w_ih (H, D), w_hh (H, H), b_ih/b_hh (H,),
    w_out (O, H), b_out (O,).
    """
    H, D = w_ih.shape
    O = w_out.shape[0]
    w_rec = jnp.zeros((_REC_PAD + H, H), jnp.float32)
    w_rec = w_rec.at[0:D, :].set(jnp.asarray(w_ih, jnp.float32).T)
    w_rec = w_rec.at[D, :].set(jnp.asarray(b_ih + b_hh, jnp.float32))
    w_rec = w_rec.at[_REC_PAD:_REC_PAD + H, :].set(jnp.asarray(w_hh, jnp.float32).T)

    w_outp = jnp.zeros((H + _REC_PAD, O), jnp.float32)
    w_outp = w_outp.at[0:H, :].set(jnp.asarray(w_out, jnp.float32).T)
    w_outp = w_outp.at[H, :].set(jnp.asarray(b_out, jnp.float32))
    return w_rec, w_outp


@jax.jit
def rnn_forward(x, w_rec, w_outp):
    """x: (B, T, D) f32, packed params from pack_params(). Returns (B, O) f32."""
    B, T, D = x.shape
    O = w_outp.shape[1]
    vmem = pl.BlockSpec(memory_space=pltpu.MemorySpace.VMEM)
    return pl.pallas_call(
        rnn_kernel,
        out_shape=jax.ShapeDtypeStruct((B, O), jnp.float32),
        in_specs=[vmem, vmem, vmem],
        out_specs=vmem,
    )(x.astype(jnp.float32), w_rec, w_outp)


def rnn_model_reference(x, w_ih, w_hh, b_ih, b_hh, w_out, b_out):
    """Pure-JAX f32 reference matching PyTorch nn.RNN (tanh) + Linear on last step."""
    B, T, D = x.shape
    H = w_hh.shape[0]

    def step(h, x_t):
        h_new = jnp.tanh(x_t @ w_ih.T + b_ih + h @ w_hh.T + b_hh)
        return h_new, h_new

    h0 = jnp.zeros((B, H), jnp.float32)
    h_last, _ = lax.scan(step, h0, jnp.swapaxes(x, 0, 1))
    return h_last @ w_out.T + b_out


if __name__ == "__main__":
    # Small shapes consistent with the module's forward.
    B, T, D, H, O = 2, 8, 4, 32, 16

    key = jax.random.PRNGKey(0)
    keys = jax.random.split(key, 7)
    bound = 1.0 / jnp.sqrt(H)

    x = jax.random.normal(keys[0], (B, T, D), jnp.float32)
    w_ih = jax.random.uniform(keys[1], (H, D), jnp.float32, -bound, bound)
    w_hh = jax.random.uniform(keys[2], (H, H), jnp.float32, -bound, bound)
    b_ih = jax.random.uniform(keys[3], (H,), jnp.float32, -bound, bound)
    b_hh = jax.random.uniform(keys[4], (H,), jnp.float32, -bound, bound)
    w_out = jax.random.uniform(keys[5], (O, H), jnp.float32, -bound, bound)
    b_out = jax.random.uniform(keys[6], (O,), jnp.float32, -bound, bound)

    # One-time weight packing (load-time), then the per-call forward.
    w_rec, w_outp = pack_params(w_ih, w_hh, b_ih, b_hh, w_out, b_out)
    w_rec, w_outp = jax.block_until_ready((w_rec, w_outp))

    y = rnn_forward(x, w_rec, w_outp)
    y = jax.block_until_ready(y)

    y_ref = rnn_model_reference(x, w_ih, w_hh, b_ih, b_hh, w_out, b_out)
    assert y.shape == (B, O)
    # bf16 MXU operands (f32 accumulate / tanh) => relaxed tolerance vs f32 ref.
    assert jnp.allclose(y, y_ref, rtol=3e-2, atol=3e-2), \
        f"max abs err {jnp.max(jnp.abs(y - y_ref))}"

    print("KERNEL_OK")
</pallas_src>

<mosaic_0001>
module attributes {stable_mosaic.version = 11 : i64} {
  func.func @rnn_kernel(%arg0: memref<2x8x4xf32, #tpu.memory_space<vmem>>, %arg1: memref<40x32xf32, #tpu.memory_space<vmem>>, %arg2: memref<40x16xf32, #tpu.memory_space<vmem>>, %arg3: memref<2x16xf32, #tpu.memory_space<vmem>>) attributes {dimension_semantics = [], scalar_prefetch = 0 : i64, scratch_operands = 0 : i64, tpu.core_type = #tpu.core_type<tc>} {
    %c0 = arith.constant 0 : index
    %c0_0 = arith.constant 0 : index
    %0 = vector.load %arg1[%c0, %c0_0] : memref<40x32xf32, #tpu.memory_space<vmem>>, vector<40x32xf32>
    %1 = vector.extract_strided_slice %0 {offsets = [0, 0], sizes = [4, 32], strides = [1, 1]} : vector<40x32xf32> to vector<4x32xf32>
    %2 = arith.truncf %1 : vector<4x32xf32> to vector<4x32xbf16>
    %3 = vector.extract_strided_slice %0 {offsets = [4, 0], sizes = [1, 32], strides = [1, 1]} : vector<40x32xf32> to vector<1x32xf32>
    %4 = vector.extract_strided_slice %0 {offsets = [8, 0], sizes = [32, 32], strides = [1, 1]} : vector<40x32xf32> to vector<32x32xf32>
    %5 = arith.truncf %4 : vector<32x32xf32> to vector<32x32xbf16>
    %c0_1 = arith.constant 0 : index
    %c0_2 = arith.constant 0 : index
    %c0_3 = arith.constant 0 : index
    %6 = vector.load %arg0[%c0_1, %c0_2, %c0_3] : memref<2x8x4xf32, #tpu.memory_space<vmem>>, vector<2x8x4xf32>
    %7 = vector.shape_cast %6 : vector<2x8x4xf32> to vector<16x4xf32>
    %8 = arith.truncf %7 : vector<16x4xf32> to vector<16x4xbf16>
    %cst = arith.constant dense<0.000000e+00> : vector<16x32xf32>
    %9 = tpu.matmul %8, %2, %cst {dimension_numbers = #tpu.dot_dimension_numbers<[1], [0], [0], [1], [0, 0, 1, 1], [], []>} : vector<16x4xbf16>, vector<4x32xbf16>, vector<16x32xf32> -> vector<16x32xf32>
    %10 = vector.broadcast %3 : vector<1x32xf32> to vector<16x32xf32>
    %11 = arith.addf %9, %10 : vector<16x32xf32>
    %12 = vector.shape_cast %11 : vector<16x32xf32> to vector<2x8x32xf32>
    %13 = vector.extract_strided_slice %12 {offsets = [0, 0, 0], sizes = [2, 1, 32], strides = [1, 1, 1]} : vector<2x8x32xf32> to vector<2x1x32xf32>
    %14 = vector.shape_cast %13 : vector<2x1x32xf32> to vector<2x32xf32>
    %15 = math.tanh %14 : vector<2x32xf32>
    %16 = vector.extract_strided_slice %12 {offsets = [0, 1, 0], sizes = [2, 1, 32], strides = [1, 1, 1]} : vector<2x8x32xf32> to vector<2x1x32xf32>
    %17 = vector.shape_cast %16 : vector<2x1x32xf32> to vector<2x32xf32>
    %18 = arith.truncf %15 : vector<2x32xf32> to vector<2x32xbf16>
    %cst_4 = arith.constant dense<0.000000e+00> : vector<2x32xf32>
    %19 = tpu.matmul %18, %5, %cst_4 {dimension_numbers = #tpu.dot_dimension_numbers<[1], [0], [0], [1], [0, 0, 1, 1], [], []>} : vector<2x32xbf16>, vector<32x32xbf16>, vector<2x32xf32> -> vector<2x32xf32>
    %20 = arith.addf %17, %19 : vector<2x32xf32>
    %21 = math.tanh %20 : vector<2x32xf32>
    %22 = vector.extract_strided_slice %12 {offsets = [0, 2, 0], sizes = [2, 1, 32], strides = [1, 1, 1]} : vector<2x8x32xf32> to vector<2x1x32xf32>
    %23 = vector.shape_cast %22 : vector<2x1x32xf32> to vector<2x32xf32>
    %24 = arith.truncf %21 : vector<2x32xf32> to vector<2x32xbf16>
    %cst_5 = arith.constant dense<0.000000e+00> : vector<2x32xf32>
    %25 = tpu.matmul %24, %5, %cst_5 {dimension_numbers = #tpu.dot_dimension_numbers<[1], [0], [0], [1], [0, 0, 1, 1], [], []>} : vector<2x32xbf16>, vector<32x32xbf16>, vector<2x32xf32> -> vector<2x32xf32>
    %26 = arith.addf %23, %25 : vector<2x32xf32>
    %27 = math.tanh %26 : vector<2x32xf32>
    %28 = vector.extract_strided_slice %12 {offsets = [0, 3, 0], sizes = [2, 1, 32], strides = [1, 1, 1]} : vector<2x8x32xf32> to vector<2x1x32xf32>
    %29 = vector.shape_cast %28 : vector<2x1x32xf32> to vector<2x32xf32>
    %30 = arith.truncf %27 : vector<2x32xf32> to vector<2x32xbf16>
    %cst_6 = arith.constant dense<0.000000e+00> : vector<2x32xf32>
    %31 = tpu.matmul %30, %5, %cst_6 {dimension_numbers = #tpu.dot_dimension_numbers<[1], [0], [0], [1], [0, 0, 1, 1], [], []>} : vector<2x32xbf16>, vector<32x32xbf16>, vector<2x32xf32> -> vector<2x32xf32>
    %32 = arith.addf %29, %31 : vector<2x32xf32>
    %33 = math.tanh %32 : vector<2x32xf32>
    %34 = vector.extract_strided_slice %12 {offsets = [0, 4, 0], sizes = [2, 1, 32], strides = [1, 1, 1]} : vector<2x8x32xf32> to vector<2x1x32xf32>
    %35 = vector.shape_cast %34 : vector<2x1x32xf32> to vector<2x32xf32>
    %36 = arith.truncf %33 : vector<2x32xf32> to vector<2x32xbf16>
    %cst_7 = arith.constant dense<0.000000e+00> : vector<2x32xf32>
    %37 = tpu.matmul %36, %5, %cst_7 {dimension_numbers = #tpu.dot_dimension_numbers<[1], [0], [0], [1], [0, 0, 1, 1], [], []>} : vector<2x32xbf16>, vector<32x32xbf16>, vector<2x32xf32> -> vector<2x32xf32>
    %38 = arith.addf %35, %37 : vector<2x32xf32>
    %39 = math.tanh %38 : vector<2x32xf32>
    %40 = vector.extract_strided_slice %12 {offsets = [0, 5, 0], sizes = [2, 1, 32], strides = [1, 1, 1]} : vector<2x8x32xf32> to vector<2x1x32xf32>
    %41 = vector.shape_cast %40 : vector<2x1x32xf32> to vector<2x32xf32>
    %42 = arith.truncf %39 : vector<2x32xf32> to vector<2x32xbf16>
    %cst_8 = arith.constant dense<0.000000e+00> : vector<2x32xf32>
    %43 = tpu.matmul %42, %5, %cst_8 {dimension_numbers = #tpu.dot_dimension_numbers<[1], [0], [0], [1], [0, 0, 1, 1], [], []>} : vector<2x32xbf16>, vector<32x32xbf16>, vector<2x32xf32> -> vector<2x32xf32>
    %44 = arith.addf %41, %43 : vector<2x32xf32>
    %45 = math.tanh %44 : vector<2x32xf32>
    %46 = vector.extract_strided_slice %12 {offsets = [0, 6, 0], sizes = [2, 1, 32], strides = [1, 1, 1]} : vector<2x8x32xf32> to vector<2x1x32xf32>
    %47 = vector.shape_cast %46 : vector<2x1x32xf32> to vector<2x32xf32>
    %48 = arith.truncf %45 : vector<2x32xf32> to vector<2x32xbf16>
    %cst_9 = arith.constant dense<0.000000e+00> : vector<2x32xf32>
    %49 = tpu.matmul %48, %5, %cst_9 {dimension_numbers = #tpu.dot_dimension_numbers<[1], [0], [0], [1], [0, 0, 1, 1], [], []>} : vector<2x32xbf16>, vector<32x32xbf16>, vector<2x32xf32> -> vector<2x32xf32>
    %50 = arith.addf %47, %49 : vector<2x32xf32>
    %51 = math.tanh %50 : vector<2x32xf32>
    %52 = vector.extract_strided_slice %12 {offsets = [0, 7, 0], sizes = [2, 1, 32], strides = [1, 1, 1]} : vector<2x8x32xf32> to vector<2x1x32xf32>
    %53 = vector.shape_cast %52 : vector<2x1x32xf32> to vector<2x32xf32>
    %54 = arith.truncf %51 : vector<2x32xf32> to vector<2x32xbf16>
    %cst_10 = arith.constant dense<0.000000e+00> : vector<2x32xf32>
    %55 = tpu.matmul %54, %5, %cst_10 {dimension_numbers = #tpu.dot_dimension_numbers<[1], [0], [0], [1], [0, 0, 1, 1], [], []>} : vector<2x32xbf16>, vector<32x32xbf16>, vector<2x32xf32> -> vector<2x32xf32>
    %56 = arith.addf %53, %55 : vector<2x32xf32>
    %57 = math.tanh %56 : vector<2x32xf32>
    %c0_11 = arith.constant 0 : index
    %c0_12 = arith.constant 0 : index
    %58 = vector.load %arg2[%c0_11, %c0_12] : memref<40x16xf32, #tpu.memory_space<vmem>>, vector<40x16xf32>
    %59 = vector.extract_strided_slice %58 {offsets = [0, 0], sizes = [32, 16], strides = [1, 1]} : vector<40x16xf32> to vector<32x16xf32>
    %60 = arith.truncf %59 : vector<32x16xf32> to vector<32x16xbf16>
    %61 = vector.extract_strided_slice %58 {offsets = [32, 0], sizes = [1, 16], strides = [1, 1]} : vector<40x16xf32> to vector<1x16xf32>
    %62 = arith.truncf %57 : vector<2x32xf32> to vector<2x32xbf16>
    %cst_13 = arith.constant dense<0.000000e+00> : vector<2x16xf32>
    %63 = tpu.matmul %62, %60, %cst_13 {dimension_numbers = #tpu.dot_dimension_numbers<[1], [0], [0], [1], [0, 0, 1, 1], [], []>} : vector<2x32xbf16>, vector<32x16xbf16>, vector<2x16xf32> -> vector<2x16xf32>
    %64 = vector.broadcast %61 : vector<1x16xf32> to vector<2x16xf32>
    %65 = arith.addf %63, %64 : vector<2x16xf32>
    %c0_14 = arith.constant 0 : index
    %c0_15 = arith.constant 0 : index
    %66 = vector.load %arg3[%c0_14, %c0_15] : memref<2x16xf32, #tpu.memory_space<vmem>>, vector<2x16xf32>
    tpu.vector_store %arg3[%c0_14, %c0_15], %65 {strides = array<i32>} : memref<2x16xf32, #tpu.memory_space<vmem>>, vector<2x16xf32>,
    return
  }
}

</mosaic_0001>

<bundles_post_ra>
// kernel: rnn_forward.1
= control target key start
LH: loop header
LB: loop body
LE: loop exit
PB: predicated region body
PF: predicated region fallthrough
CT: control target
= control target key end

     0   :  { %vm35_vm0 = vcmask 1041408   ;;  %v759_v3 = vmov 0.0   ;;  %vm760_vm1 = vmmov 0   ;;  %s923_s0 = inlined_call_operand.vmem [shape: f32[2,8,4], index: 0, kind: input, shape index: {}]   ;;  %s924_s1 = inlined_call_operand.vmem [shape: f32[40,32], index: 1, kind: input, shape index: {}]   ;;  %s925_s2 = inlined_call_operand.vmem [shape: f32[40,16], index: 2, kind: input, shape index: {}]   ;;  %s926_s3 = inlined_call_operand.hbm [shape: f32[2,16], index: 3, kind: output, shape index: {}]  }
   0x1   :  { %v16_v0 = vld [vmem:[%s924_s1] sm:$0xff]  ;;  %v25_v2 = vld [vmem:[%s923_s0 + $0x8] sm:$0xff]  ;;  %630 = vmatprep.subr.bf16.mxu0 %v759_v3  ;;  %632 = vmatprep.mubr.msk.bf16.mxu0 %vm760_vm1, %v759_v3 }
   0x2   :  { %v24_v1 = vld [vmem:[%s923_s0] sm:$0xff]  ;;  %v21_v4 = vpack.c.bf16 %v16_v0, %v16_v0 }
   0x3   :  { %8 = vsyncpa [#allocation3], 0  ;;  %636 = vmatprep.subr.bf16.mxu1 %v759_v3  ;;  %640 = vmatprep.mubr.msk.bf16.mxu1 %vm760_vm1, %v759_v3  ;;  %v26_v6 = vpack.c.bf16 %v25_v2, %v24_v1  ;;  %vm31_vm2 = vcmask 31744   ;;  %v17_v7 = vld [vmem:[%s924_s1 + $0x8] sm:$0xff]  ;;  %v18_v8 = vld [vmem:[%s924_s1 + $0x10] sm:$0xff]  ;;  %v27_v13 = vlaneseq  ;;  %vm89_vm3 = vcmask 1041409  }
   0x4   :  { %v37_v5 = vsel %vm35_vm0, %v21_v4, 0  ;;  %v19_v9 = vld [vmem:[%s924_s1 + $0x18] sm:$0xff]  ;;  %v809_v10 = vpack.c.bf16 %v18_v8, %v17_v7  ;;  %v20_v11 = vld [vmem:[%s924_s1 + $0x20] sm:$0xff]  ;;  %vm92_vm4 = vcmask 261120   ;;  %s761_s7 = smov [#allocation2]   ;;  %vm579_vm5 = vcmask 123904  }
   0x5   :  { %631 = vmatpush3.bf16.msra.mxu0 %v37_v5  ;;  %v815_v12 = vpack.c.bf16 %v20_v11, %v19_v9  ;;  %v824_v14 = vshrl.u32 %v27_v13, 7  ;;  %s587_s8 = sshll.u32 %s761_s7, 4  ;;  %s588_s8 = int_to_ptr.vmem [resolvable:$true] %s587_s8 }
   0x6   :  { %644 = vmatprep.subr.bf16.mxu0 %v759_v3  ;;  %637 = vmatpush3.bf16.msra.mxu1 %v809_v10  ;;  %s735_s9 = scalar_lea.vmem %s588_s8, 32  ;;  %p740_p1 = scmp.lt.s32.totalorder %s588_s8, %s588_s8 }
   0x7   :  { %638 = vmatprep.subr.bf16.mxu1 %v759_v3  ;;  %v29_v15 = vsub.s32 4, %v824_v14  ;;  %p736_p0 = scmp.ne.s32.totalorder %s588_s8, %s735_s9  ;;  %p741_p2 = scmp.lt.s32.totalorder %s735_s9, %s735_s9 }
   0x8   :  { %633 = vmatmul.mubr.msk.bf16.vlgmr.msra.gmra.mrb[0].mxu0 %vm31_vm2, %v26_v6 }
   0x9   :  { %648 = vmatprep.mubr.msk.bf16.mxu0 %vm760_vm1, %v759_v3  ;;  %645 = vmatpush3.bf16.msra.mxu0 %v809_v10  ;;  %v30_v16 = vrot.slane %v16_v0, %v29_v15  ;;  %p742_p3 = por %p741_p2, %p740_p1 }
   0xa   :  { %646 = vmatprep.subr.bf16.mxu0 %v759_v3  ;;  %639 = vmatpush3.bf16.msra.mxu1 %v815_v12 }
   0xb   :  { %652 = vmatprep.subr.bf16.mxu1 %v759_v3  ;;  %p743_p4 = pnand %p742_p3, %p736_p0 }
   0xd   :  { %647 = vmatpush3.bf16.msra.mxu0 %v815_v12 }
   0xe   :  { %660 = vmatprep.subr.bf16.mxu0 %v759_v3 }
  0xdb   :  { %v73_v17 = vpop.f32.mrb[0].mxu0 }
  0xdc   :  { %v827_v18 = vadd.f32 %v73_v17, %v30_v16  ;;  %v634_v19 = vpop.f32.mrb[1].mxu0 }
  0xdd   :  { %v76_v20 = vpop.f32.mrb[2].mxu0 }
  0xde   :  { %v829_v21 = vadd.f32 %v76_v20, %v30_v16  ;;  %v635_v22 = vpop.f32.mrb[3].mxu0  ;;  %703 = vtanh.f32 %v827_v18 }
  0xe0   :  { %705 = vtanh.f32 %v829_v21 }
  0xe8   :  { %v704_v23 = vpop.eup %703 }
  0xe9   :  { %v82_v25 = vpack.c.bf16 %v704_v23, %v704_v23 }
  0xea   :  { %v706_v24 = vpop.eup %705 }
  0xeb   :  { %v83_v26 = vpack.c.bf16 %v706_v24, %v706_v24  ;;  %v86_v28 = vunpack.c.l.b16 %v82_v25 }
  0xed   :  { %v87_v27 = vunpack.c.l.b16 %v83_v26 }
  0xef   :  { %v88_v29 = vrot.slane %v87_v27, 7 }
  0xf1   :  { %v90_v30 = vsel %vm89_vm3, %v88_v29, %v86_v28 }
  0xf2   :  { %v91_v31 = vpack.c.b16 %v90_v30, %v90_v30 }
  0xf4   :  { %641 = vmatmul.mubr.msk.bf16.vlgmr.msra.gmra.mrb[0].mxu1 %vm92_vm4, %v91_v31 }
  0xf5   :  { %653 = vmatpush3.bf16.msra.mxu1 %v809_v10  ;;  %656 = vmatprep.mubr.msk.bf16.mxu1 %vm760_vm1, %v759_v3 }
  0xf6   :  { %654 = vmatprep.subr.bf16.mxu1 %v759_v3 }
  0xf9   :  { %655 = vmatpush3.bf16.msra.mxu1 %v815_v12 }
  0xfa   :  { %668 = vmatprep.subr.bf16.mxu1 %v759_v3 }
 0x1c7   :  { %v130_v32 = vpop.f32.mrb[0].mxu1 }
 0x1c8   :  { %v137_v33 = vrot.slane %v130_v32, 7  ;;  %v141_v34 = vadd.f32 %v130_v32, %v829_v21  ;;  %v642_v35 = vpop.f32.mrb[1].mxu1 }
 0x1c9   :  { %v133_v36 = vpop.f32.mrb[2].mxu1 }
 0x1ca   :  { %v140_v37 = vadd.f32 %v137_v33, %v827_v18  ;;  %707 = vtanh.f32 %v141_v34  ;;  %v643_v38 = vpop.f32.mrb[3].mxu1 }
 0x1cc   :  { %709 = vtanh.f32 %v140_v37 }
 0x1d4   :  { %v708_v39 = vpop.eup %707 }
 0x1d5   :  { %v145_v42 = vpack.c.bf16 %v708_v39, %v708_v39 }
 0x1d6   :  { %v710_v40 = vpop.eup %709 }
 0x1d7   :  { %v144_v41 = vpack.c.bf16 %v710_v40, %v710_v40  ;;  %v149_v44 = vunpack.c.l.b16 %v145_v42 }
 0x1d9   :  { %v148_v43 = vunpack.c.l.b16 %v144_v41 }
 0x1db   :  { %v150_v45 = vrot.slane %v148_v43, 1 }
 0x1dd   :  { %v151_v46 = vsel %vm89_vm3, %v149_v44, %v150_v45 }
 0x1de   :  { %v152_v47 = vpack.c.b16 %v151_v46, %v151_v46 }
 0x1e0   :  { %649 = vmatmul.mubr.msk.bf16.vlgmr.msra.gmra.mrb[4].mxu0 %vm92_vm4, %v152_v47 }
 0x1e1   :  { %661 = vmatpush3.bf16.msra.mxu0 %v809_v10  ;;  %664 = vmatprep.mubr.msk.bf16.mxu0 %vm760_vm1, %v759_v3 }
 0x1e2   :  { %662 = vmatprep.subr.bf16.mxu0 %v759_v3 }
 0x1e5   :  { %663 = vmatpush3.bf16.msra.mxu0 %v815_v12 }
 0x1e6   :  { %676 = vmatprep.subr.bf16.mxu0 %v759_v3 }
 0x2b3   :  { %v190_v48 = vpop.f32.mrb[4].mxu0 }
 0x2b4   :  { %v197_v49 = vrot.slane %v190_v48, 6  ;;  %v198_v50 = vrot.slane %v190_v48, 7  ;;  %v650_v51 = vpop.f32.mrb[5].mxu0 }
 0x2b5   :  { %v193_v52 = vpop.f32.mrb[6].mxu0 }
 0x2b6   :  { %v201_v53 = vadd.f32 %v197_v49, %v827_v18  ;;  %v202_v54 = vadd.f32 %v198_v50, %v829_v21  ;;  %v651_v55 = vpop.f32.mrb[7].mxu0 }
 0x2b8   :  { %711 = vtanh.f32 %v201_v53 }
 0x2b9   :  { %713 = vtanh.f32 %v202_v54 }
 0x2c2   :  { %v712_v56 = vpop.eup %711 }
 0x2c3   :  { %v714_v57 = vpop.eup %713  ;;  %v205_v58 = vpack.c.bf16 %v712_v56, %v712_v56 }
 0x2c4   :  { %v206_v59 = vpack.c.bf16 %v714_v57, %v714_v57 }
 0x2c5   :  { %v209_v60 = vunpack.c.l.b16 %v205_v58 }
 0x2c6   :  { %v210_v61 = vunpack.c.l.b16 %v206_v59 }
 0x2c7   :  { %v211_v62 = vrot.slane %v209_v60, 2 }
 0x2c8   :  { %v212_v63 = vrot.slane %v210_v61, 1 }
 0x2ca   :  { %v213_v0 = vsel %vm89_vm3, %v212_v63, %v211_v62 }
 0x2cb   :  { %v214_v1 = vpack.c.b16 %v213_v0, %v213_v0 }
 0x2cd   :  { %657 = vmatmul.mubr.msk.bf16.vlgmr.msra.gmra.mrb[4].mxu1 %vm92_vm4, %v214_v1 }
 0x2ce   :  { %669 = vmatpush3.bf16.msra.mxu1 %v809_v10  ;;  %672 = vmatprep.mubr.msk.bf16.mxu1 %vm760_vm1, %v759_v3 }
 0x2cf   :  { %670 = vmatprep.subr.bf16.mxu1 %v759_v3 }
 0x2d2   :  { %671 = vmatpush3.bf16.msra.mxu1 %v815_v12 }
 0x2d3   :  { %684 = vmatprep.subr.bf16.mxu1 %v759_v3 }
 0x3a0   :  { %v252_v2 = vpop.f32.mrb[4].mxu1 }
 0x3a1   :  { %v259_v4 = vrot.slane %v252_v2, 5  ;;  %v260_v5 = vrot.slane %v252_v2, 6  ;;  %v658_v6 = vpop.f32.mrb[5].mxu1 }
 0x3a2   :  { %v255_v7 = vpop.f32.mrb[6].mxu1 }
 0x3a3   :  { %v263_v8 = vadd.f32 %v259_v4, %v827_v18  ;;  %v264_v9 = vadd.f32 %v260_v5, %v829_v21  ;;  %v659_v11 = vpop.f32.mrb[7].mxu1 }
 0x3a5   :  { %715 = vtanh.f32 %v263_v8 }
 0x3a6   :  { %717 = vtanh.f32 %v264_v9 }
 0x3af   :  { %v716_v13 = vpop.eup %715 }
 0x3b0   :  { %v718_v15 = vpop.eup %717  ;;  %v267_v16 = vpack.c.bf16 %v716_v13, %v716_v13 }
 0x3b1   :  { %v268_v17 = vpack.c.bf16 %v718_v15, %v718_v15 }
 0x3b2   :  { %v271_v19 = vunpack.c.l.b16 %v267_v16 }
 0x3b3   :  { %v272_v20 = vunpack.c.l.b16 %v268_v17 }
 0x3b4   :  { %v273_v22 = vrot.slane %v271_v19, 3  ;;  %v515_v19 = vld [vmem:[%s925_s2] sm:$0xff] }
 0x3b5   :  { %v274_v23 = vrot.slane %v272_v20, 2  ;;  %v516_v20 = vld [vmem:[%s925_s2 + $0x8] sm:$0xff] }
 0x3b7   :  { %v275_v24 = vsel %vm89_vm3, %v274_v23, %v273_v22  ;;  %v520_v22 = vpack.c.bf16 %v516_v20, %v515_v19  ;;  %v517_v23 = vld [vmem:[%s925_s2 + $0x10] sm:$0xff] }
 0x3b8   :  { %v276_v25 = vpack.c.b16 %v275_v24, %v275_v24  ;;  %v518_v24 = vld [vmem:[%s925_s2 + $0x18] sm:$0xff] }
 0x3ba   :  { %665 = vmatmul.mubr.msk.bf16.vlgmr.msra.gmra.mrb[8].mxu0 %vm92_vm4, %v276_v25  ;;  %v521_v25 = vpack.c.bf16 %v518_v24, %v517_v23 }
 0x3bb   :  { %677 = vmatpush3.bf16.msra.mxu0 %v809_v10  ;;  %680 = vmatprep.mubr.msk.bf16.mxu0 %vm760_vm1, %v759_v3 }
 0x3bc   :  { %678 = vmatprep.subr.bf16.mxu0 %v759_v3 }
 0x3bf   :  { %679 = vmatpush3.bf16.msra.mxu0 %v815_v12 }
 0x3c0   :  { %692 = vmatprep.subr.bf16.mxu0 %v759_v3 }
 0x48d   :  { %v314_v26 = vpop.f32.mrb[8].mxu0 }
 0x48e   :  { %v321_v27 = vrot.slane %v314_v26, 4  ;;  %v322_v28 = vrot.slane %v314_v26, 5  ;;  %v666_v29 = vpop.f32.mrb[9].mxu0 }
 0x48f   :  { %v317_v30 = vpop.f32.mrb[10].mxu0 }
 0x490   :  { %v325_v31 = vadd.f32 %v321_v27, %v827_v18  ;;  %v326_v32 = vadd.f32 %v322_v28, %v829_v21  ;;  %v667_v33 = vpop.f32.mrb[11].mxu0 }
 0x492   :  { %719 = vtanh.f32 %v325_v31 }
 0x493   :  { %721 = vtanh.f32 %v326_v32 }
 0x49c   :  { %v720_v34 = vpop.eup %719 }
 0x49d   :  { %v722_v35 = vpop.eup %721  ;;  %v329_v36 = vpack.c.bf16 %v720_v34, %v720_v34 }
 0x49e   :  { %v330_v37 = vpack.c.bf16 %v722_v35, %v722_v35 }
 0x49f   :  { %v333_v38 = vunpack.c.l.b16 %v329_v36 }
 0x4a0   :  { %v334_v39 = vunpack.c.l.b16 %v330_v37 }
 0x4a1   :  { %v335_v40 = vrot.slane %v333_v38, 4 }
 0x4a2   :  { %v336_v41 = vrot.slane %v334_v39, 3 }
 0x4a4   :  { %v337_v42 = vsel %vm89_vm3, %v336_v41, %v335_v40 }
 0x4a5   :  { %v338_v43 = vpack.c.b16 %v337_v42, %v337_v42 }
 0x4a7   :  { %673 = vmatmul.mubr.msk.bf16.vlgmr.msra.gmra.mrb[8].mxu1 %vm92_vm4, %v338_v43 }
 0x4a8   :  { %685 = vmatpush3.bf16.msra.mxu1 %v809_v10  ;;  %688 = vmatprep.mubr.msk.bf16.mxu1 %vm760_vm1, %v759_v3 }
 0x4a9   :  { %686 = vmatprep.subr.bf16.mxu1 %v759_v3 }
 0x4ac   :  { %687 = vmatpush3.bf16.msra.mxu1 %v815_v12 }
 0x57a   :  { %v376_v44 = vpop.f32.mrb[8].mxu1 }
 0x57b   :  { %v383_v45 = vrot.slane %v376_v44, 3  ;;  %v384_v46 = vrot.slane %v376_v44, 4  ;;  %v674_v47 = vpop.f32.mrb[9].mxu1 }
 0x57c   :  { %v379_v48 = vpop.f32.mrb[10].mxu1 }
 0x57d   :  { %v387_v49 = vadd.f32 %v383_v45, %v827_v18  ;;  %v388_v50 = vadd.f32 %v384_v46, %v829_v21  ;;  %v675_v51 = vpop.f32.mrb[11].mxu1 }
 0x57f   :  { %723 = vtanh.f32 %v387_v49 }
 0x580   :  { %725 = vtanh.f32 %v388_v50 }
 0x589   :  { %v724_v10 = vpop.eup %723 }
 0x58a   :  { %v726_v52 = vpop.eup %725  ;;  %v391_v53 = vpack.c.bf16 %v724_v10, %v724_v10 }
 0x58b   :  { %v392_v54 = vpack.c.bf16 %v726_v52, %v726_v52 }
 0x58c   :  { %v395_v55 = vunpack.c.l.b16 %v391_v53 }
 0x58d   :  { %v396_v56 = vunpack.c.l.b16 %v392_v54 }
 0x58e   :  { %v397_v57 = vrot.slane %v395_v55, 5 }
 0x58f   :  { %v398_v12 = vrot.slane %v396_v56, 4 }
 0x591   :  { %v399_v58 = vsel %vm89_vm3, %v398_v12, %v397_v57 }
 0x592   :  { %v400_v59 = vpack.c.b16 %v399_v58, %v399_v58 }
 0x594   :  { %681 = vmatmul.mubr.msk.bf16.vlgmr.msra.gmra.mrb[12].mxu0 %vm92_vm4, %v400_v59 }
 0x595   :  { %696 = vmatprep.mubr.msk.bf16.mxu0 %vm760_vm1, %v759_v3  ;;  %693 = vmatpush3.bf16.msra.mxu0 %v520_v22 }
 0x596   :  { %694 = vmatprep.subr.bf16.mxu0 %v759_v3 }
 0x599   :  { %695 = vmatpush3.bf16.msra.mxu0 %v521_v25 }
 0x667   :  { %v438_v60 = vpop.f32.mrb[12].mxu0 }
 0x668   :  { %v445_v61 = vrot.slane %v438_v60, 2  ;;  %v446_v62 = vrot.slane %v438_v60, 3  ;;  %v682_v63 = vpop.f32.mrb[13].mxu0 }
 0x669   :  { %v441_v0 = vpop.f32.mrb[14].mxu0 }
 0x66a   :  { %v449_v1 = vadd.f32 %v445_v61, %v827_v18  ;;  %v450_v2 = vadd.f32 %v446_v62, %v829_v21  ;;  %v683_v4 = vpop.f32.mrb[15].mxu0 }
 0x66c   :  { %727 = vtanh.f32 %v449_v1 }
 0x66d   :  { %729 = vtanh.f32 %v450_v2 }
 0x676   :  { %v728_v5 = vpop.eup %727 }
 0x677   :  { %v730_v6 = vpop.eup %729  ;;  %v453_v7 = vpack.c.bf16 %v728_v5, %v728_v5 }
 0x678   :  { %v454_v8 = vpack.c.bf16 %v730_v6, %v730_v6 }
 0x679   :  { %v457_v9 = vunpack.c.l.b16 %v453_v7 }
 0x67a   :  { %v458_v11 = vunpack.c.l.b16 %v454_v8 }
 0x67b   :  { %v459_v13 = vrot.slane %v457_v9, 6 }
 0x67c   :  { %v460_v15 = vrot.slane %v458_v11, 5 }
 0x67e   :  { %v461_v16 = vsel %vm89_vm3, %v460_v15, %v459_v13 }
 0x67f   :  { %v462_v17 = vpack.c.b16 %v461_v16, %v461_v16 }
 0x681   :  { %689 = vmatmul.mubr.msk.bf16.vlgmr.msra.gmra.mrb[12].mxu1 %vm92_vm4, %v462_v17 }
 0x754   :  { %v500_v26 = vpop.f32.mrb[12].mxu1 }
 0x755   :  { %v507_v27 = vrot.slane %v500_v26, 1  ;;  %v508_v28 = vrot.slane %v500_v26, 2  ;;  %v690_v29 = vpop.f32.mrb[13].mxu1 }
 0x756   :  { %v503_v30 = vpop.f32.mrb[14].mxu1 }
 0x757   :  { %v511_v31 = vadd.f32 %v507_v27, %v827_v18  ;;  %v512_v32 = vadd.f32 %v508_v28, %v829_v21  ;;  %v691_v3 = vpop.f32.mrb[15].mxu1  ;;  %v526_v18 = vsub.s32 0, %v824_v14  ;;  %v519_v21 = vld [vmem:[%s925_s2 + $0x20] sm:$0xff] }
 0x759   :  { %731 = vtanh.f32 %v511_v31  ;;  %v527_v43 = vrot.slane %v519_v21, %v526_v18 }
 0x75a   :  { %733 = vtanh.f32 %v512_v32 }
 0x763   :  { %v732_v33 = vpop.eup %731 }
 0x764   :  { %v734_v34 = vpop.eup %733  ;;  %v522_v35 = vpack.c.bf16 %v732_v33, %v732_v33 }
 0x765   :  { %v523_v36 = vpack.c.bf16 %v734_v34, %v734_v34 }
 0x766   :  { %v530_v37 = vunpack.c.l.b16 %v522_v35 }
 0x767   :  { %v531_v38 = vunpack.c.l.b16 %v523_v36 }
 0x768   :  { %v532_v39 = vrot.slane %v530_v37, 7 }
 0x769   :  { %v533_v40 = vrot.slane %v531_v38, 6 }
 0x76b   :  { %v534_v41 = vsel %vm89_vm3, %v533_v40, %v532_v39 }
 0x76c   :  { %v535_v42 = vpack.c.b16 %v534_v41, %v534_v41 }
 0x76e   :  { %697 = vmatmul.mubr.msk.bf16.vlgmr.msra.gmra.mrb[16].mxu0 %vm92_vm4, %v535_v42 }
 0x841   :  { %v573_v44 = vpop.f32.mrb[16].mxu0 }
 0x842   :  { %v574_v45 = vadd.f32 %v573_v44, %v527_v43  ;;  %v698_v46 = vpop.f32.mrb[17].mxu0 }
 0x843   :  { %v576_v47 = vpop.f32.mrb[18].mxu0 }
 0x844   :  { %v699_v48 = vpop.f32.mrb[19].mxu0  ;;  %580 = vst.msk [vmem:[#allocation2] sm:$0x3] %vm579_vm5, %v574_v45 }
 0x845   :  { %746 = shalt.err (!%p743_p4)
}
 0x846   :  { %s747_s11 = scalar_lea.hbm %s926_s3, 32 }
 0x847   :  { %p748_p5 = scmp.ne.s32.totalorder %s926_s3, %s747_s11  ;;  %p751_p6 = scmp.lt.u32.totalorder %s747_s11, %s926_s3 }
 0x849   :  { %p753_p7 = pnand %p751_p6, %p748_p5 }
 0x84b   :  { %756 = shalt.err (!%p753_p7)
}
 0x84c   :  { %590 = dma.vmem_to_hbm [thread:$0]  %s588_s8, 32, %s926_s3, [#allocation3]  }
 0x84d   :  { %757 = dma.done.wait [#allocation3], 32  }
 0x84e   :  { %758 = vsyncadd [#allocation3], 4294967264 }
 0x84f   :  { %594 = vsyncpa [#allocation3], 1 }

</bundles_post_ra>
